<compile_context>
chip_gen: v5e
topology: v5e:2x2
jax: 0.10.0
libtpu: 0.0.40
codegen_flags: <defaults>
</compile_context>

<pallas_src>
import functools
import math

import jax
import jax.numpy as jnp
from jax import lax
from jax.experimental import pallas as pl
from jax.experimental.pallas import tpu as pltpu


def _round_up(v, m):
    return (v + m - 1) // m * m


# ----------------------------- Pallas kernel -------------------------------

def _stft_loss_kernel(fx_ref, fy_ref, wc_ref, ws_ref, o_ref, *,
                      n_rows, n_bins, row_tile, eps):
    """Fused STFT-magnitude + loss partial-sum kernel for one row tile.

    fx_ref/fy_ref: [row_tile, n_fft]  windowless frames of x / y
    wc_ref/ws_ref: [n_fft, nbp]       window-folded cos / -sin DFT basis
    o_ref:         [1, 128]           lane 0: sum((my-mx)^2), lane 1: sum(my^2),
                                      lane 2: sum(|log my - log mx|)
    """
    step = pl.program_id(0)

    @pl.when(step == 0)
    def _init():
        o_ref[...] = jnp.zeros_like(o_ref)

    fx = fx_ref[...]
    fy = fy_ref[...]
    wc = wc_ref[...]
    ws = ws_ref[...]

    # One big MXU matmul per (input, real/imag) pair.
    xr = jnp.dot(fx, wc, preferred_element_type=jnp.float32)
    xi = jnp.dot(fx, ws, preferred_element_type=jnp.float32)
    yr = jnp.dot(fy, wc, preferred_element_type=jnp.float32)
    yi = jnp.dot(fy, ws, preferred_element_type=jnp.float32)

    mx = jnp.sqrt(jnp.maximum(xr * xr + xi * xi, eps))
    my = jnp.sqrt(jnp.maximum(yr * yr + yi * yi, eps))

    shp = mx.shape
    row_ids = lax.broadcasted_iota(jnp.int32, shp, 0) + step * row_tile
    col_ids = lax.broadcasted_iota(jnp.int32, shp, 1)
    vmask = jnp.logical_and(row_ids < n_rows, col_ids < n_bins).astype(jnp.float32)

    d = my - mx
    s_sq_diff = jnp.sum(d * d * vmask)
    s_sq_y = jnp.sum(my * my * vmask)
    s_logd = jnp.sum(jnp.abs(jnp.log(my) - jnp.log(mx)) * vmask)

    lane = lax.broadcasted_iota(jnp.int32, o_ref.shape, 1)
    part = (jnp.where(lane == 0, s_sq_diff, 0.0)
            + jnp.where(lane == 1, s_sq_y, 0.0)
            + jnp.where(lane == 2, s_logd, 0.0))
    o_ref[...] += part


# ------------------------------ Host wrapper --------------------------------

def _stft_partial_sums(x, y, fft_size, hop, win_length, eps=1e-7):
    """Returns (sum_sq_diff, sum_sq_y, sum_abs_logdiff, element_count)."""
    B, T = x.shape
    pad = fft_size // 2
    xp = jnp.pad(x, ((0, 0), (pad, pad)), mode="reflect")
    yp = jnp.pad(y, ((0, 0), (pad, pad)), mode="reflect")
    lp = T + 2 * pad
    n_frames = (lp - fft_size) // hop + 1

    # Overlapping frame extraction (strided gather) — done once per resolution.
    idx = jnp.arange(n_frames)[:, None] * hop + jnp.arange(fft_size)[None, :]
    fx = xp[:, idx].reshape(B * n_frames, fft_size)
    fy = yp[:, idx].reshape(B * n_frames, fft_size)

    n_rows = B * n_frames
    row_tile = min(256, _round_up(n_rows, 8))
    rows_p = _round_up(n_rows, row_tile)
    fx = jnp.pad(fx, ((0, rows_p - n_rows), (0, 0)))
    fy = jnp.pad(fy, ((0, rows_p - n_rows), (0, 0)))

    # Hann (periodic) window, centered/zero-padded to n_fft, folded into the
    # DFT basis matrices (cos / -sin), bins padded to a lane-dense multiple of 128.
    n = jnp.arange(win_length, dtype=jnp.float32)
    win = 0.5 * (1.0 - jnp.cos(2.0 * jnp.pi * n / win_length))
    lpad = (fft_size - win_length) // 2
    win_full = jnp.zeros((fft_size,), jnp.float32).at[lpad:lpad + win_length].set(win)

    n_bins = fft_size // 2 + 1
    nbp = _round_up(n_bins, 128)
    tk = (jnp.arange(fft_size, dtype=jnp.int32)[:, None]
          * jnp.arange(nbp, dtype=jnp.int32)[None, :]) % fft_size
    ang = (2.0 * jnp.pi / fft_size) * tk.astype(jnp.float32)
    col_valid = (jnp.arange(nbp) < n_bins).astype(jnp.float32)[None, :]
    wc = jnp.cos(ang) * win_full[:, None] * col_valid
    ws = -jnp.sin(ang) * win_full[:, None] * col_valid

    grid = (rows_p // row_tile,)
    kernel = functools.partial(_stft_loss_kernel, n_rows=n_rows, n_bins=n_bins,
                               row_tile=row_tile, eps=eps)

    out = pl.pallas_call(
        kernel,
        out_shape=jax.ShapeDtypeStruct((1, 128), jnp.float32),
        grid=grid,
        in_specs=[
            pl.BlockSpec((row_tile, fft_size), lambda i: (i, 0)),
            pl.BlockSpec((row_tile, fft_size), lambda i: (i, 0)),
            pl.BlockSpec((fft_size, nbp), lambda i: (0, 0)),
            pl.BlockSpec((fft_size, nbp), lambda i: (0, 0)),
        ],
        out_specs=pl.BlockSpec((1, 128), lambda i: (0, 0)),
        compiler_params=pltpu.CompilerParams(
            dimension_semantics=("arbitrary",)),
        cost_estimate=pl.CostEstimate(
            flops=4 * 2 * rows_p * fft_size * nbp,
            transcendentals=4 * rows_p * nbp,
            bytes_accessed=(2 * rows_p * fft_size + 2 * fft_size * nbp + 128) * 4),
    )(fx, fy, wc, ws)

    count = n_rows * n_bins
    return out[0, 0], out[0, 1], out[0, 2], count


def multi_resolution_stft_loss(x, y, fft_sizes, shift_lengths, win_lengths):
    sc_total = 0.0
    mag_total = 0.0
    for n_fft, hop, wl in zip(fft_sizes, shift_lengths, win_lengths):
        s_sq_diff, s_sq_y, s_logd, count = _stft_partial_sums(x, y, n_fft, hop, wl)
        sc_total = sc_total + jnp.sqrt(s_sq_diff) / jnp.sqrt(s_sq_y)
        mag_total = mag_total + s_logd / count
    n = len(fft_sizes)
    return sc_total / n, mag_total / n


# ---------------------- Pure-JAX reference (for checking) -------------------

def _ref_magnitude(x, fft_size, hop, win_length, eps=1e-7):
    pad = fft_size // 2
    xp = jnp.pad(x, ((0, 0), (pad, pad)), mode="reflect")
    n_frames = (xp.shape[1] - fft_size) // hop + 1
    idx = jnp.arange(n_frames)[:, None] * hop + jnp.arange(fft_size)[None, :]
    frames = xp[:, idx]
    n = jnp.arange(win_length, dtype=jnp.float32)
    win = 0.5 * (1.0 - jnp.cos(2.0 * jnp.pi * n / win_length))
    lpad = (fft_size - win_length) // 2
    win_full = jnp.zeros((fft_size,), jnp.float32).at[lpad:lpad + win_length].set(win)
    spec = jnp.fft.rfft(frames * win_full[None, None, :], axis=-1)
    power = jnp.real(spec) ** 2 + jnp.imag(spec) ** 2
    return jnp.sqrt(jnp.maximum(power, eps))


def _ref_multi_resolution_stft_loss(x, y, fft_sizes, shift_lengths, win_lengths):
    sc_total = 0.0
    mag_total = 0.0
    for n_fft, hop, wl in zip(fft_sizes, shift_lengths, win_lengths):
        mx = _ref_magnitude(x, n_fft, hop, wl)
        my = _ref_magnitude(y, n_fft, hop, wl)
        sc = jnp.sqrt(jnp.sum((my - mx) ** 2)) / jnp.sqrt(jnp.sum(my ** 2))
        mg = jnp.mean(jnp.abs(jnp.log(mx) - jnp.log(my)))
        sc_total = sc_total + sc
        mag_total = mag_total + mg
    n = len(fft_sizes)
    return sc_total / n, mag_total / n


# ---------------------------------- Main ------------------------------------

if __name__ == "__main__":
    FFT_SIZES = [128, 64]
    SHIFT_LENGTHS = [32, 16]
    WIN_LENGTHS = [128, 48]
    BATCH, TIME = 2, 256

    key = jax.random.PRNGKey(0)
    kx, ky = jax.random.split(key)
    x = jax.random.normal(kx, (BATCH, TIME), jnp.float32)
    y = jax.random.normal(ky, (BATCH, TIME), jnp.float32)

    @jax.jit
    def loss_fn(xx, yy):
        return multi_resolution_stft_loss(xx, yy, FFT_SIZES, SHIFT_LENGTHS,
                                          WIN_LENGTHS)

    sc_loss, mag_loss = loss_fn(x, y)
    sc_loss = jax.block_until_ready(sc_loss)
    mag_loss = jax.block_until_ready(mag_loss)

    sc_ref, mag_ref = _ref_multi_resolution_stft_loss(
        x, y, FFT_SIZES, SHIFT_LENGTHS, WIN_LENGTHS)

    assert bool(jnp.isfinite(sc_loss)) and bool(jnp.isfinite(mag_loss))
    assert jnp.allclose(sc_loss, sc_ref, rtol=1e-3, atol=1e-4), \
        (float(sc_loss), float(sc_ref))
    assert jnp.allclose(mag_loss, mag_ref, rtol=1e-3, atol=1e-4), \
        (float(mag_loss), float(mag_ref))

    print("KERNEL_OK")
</pallas_src>

<mosaic_0001>
module attributes {stable_mosaic.version = 11 : i64} {
  func.func @_stft_loss_kernel(%arg0: i32, %arg1: memref<24x128xf32, #tpu.memory_space<vmem>>, %arg2: memref<24x128xf32, #tpu.memory_space<vmem>>, %arg3: memref<128x128xf32, #tpu.memory_space<vmem>>, %arg4: memref<128x128xf32, #tpu.memory_space<vmem>>, %arg5: memref<1x128xf32, #tpu.memory_space<vmem>>) attributes {dimension_semantics = [#tpu.dimension_semantics<arbitrary>], iteration_bounds = array<i64: 1>, scalar_prefetch = 0 : i64, scratch_operands = 0 : i64, tpu.core_type = #tpu.core_type<tc>, window_params = [{transform_indices = @transform_0, window_bounds = array<i64: 24, 128>}, {transform_indices = @transform_1, window_bounds = array<i64: 24, 128>}, {pipeline_mode = #tpu.pipeline_mode<synchronous>, transform_indices = @transform_2, window_bounds = array<i64: 128, 128>}, {pipeline_mode = #tpu.pipeline_mode<synchronous>, transform_indices = @transform_3, window_bounds = array<i64: 128, 128>}, {pipeline_mode = #tpu.pipeline_mode<synchronous>, transform_indices = @transform_4, window_bounds = array<i64: 1, 128>}]} {
    %c0_i32 = arith.constant 0 : i32
    %0 = arith.cmpi eq, %arg0, %c0_i32 : i32
    %1 = arith.extui %0 : i1 to i32
    %c0_i32_0 = arith.constant 0 : i32
    %2 = arith.cmpi ne, %1, %c0_i32_0 : i32
    scf.if %2 {
      %cst_24 = arith.constant 0.000000e+00 : f32
      %78 = vector.broadcast %cst_24 : f32 to vector<1x128xf32>
      %c0_25 = arith.constant 0 : index
      %c0_26 = arith.constant 0 : index
      %79 = vector.load %arg5[%c0_25, %c0_26] : memref<1x128xf32, #tpu.memory_space<vmem>>, vector<1x128xf32>
      tpu.vector_store %arg5[%c0_25, %c0_26], %78 {strides = array<i32>} : memref<1x128xf32, #tpu.memory_space<vmem>>, vector<1x128xf32>,
    } else {
    }
    %c0 = arith.constant 0 : index
    %c0_1 = arith.constant 0 : index
    %3 = vector.load %arg1[%c0, %c0_1] : memref<24x128xf32, #tpu.memory_space<vmem>>, vector<24x128xf32>
    %c0_2 = arith.constant 0 : index
    %c0_3 = arith.constant 0 : index
    %4 = vector.load %arg2[%c0_2, %c0_3] : memref<24x128xf32, #tpu.memory_space<vmem>>, vector<24x128xf32>
    %c0_4 = arith.constant 0 : index
    %c0_5 = arith.constant 0 : index
    %5 = vector.load %arg3[%c0_4, %c0_5] : memref<128x128xf32, #tpu.memory_space<vmem>>, vector<128x128xf32>
    %c0_6 = arith.constant 0 : index
    %c0_7 = arith.constant 0 : index
    %6 = vector.load %arg4[%c0_6, %c0_7] : memref<128x128xf32, #tpu.memory_space<vmem>>, vector<128x128xf32>
    %cst = arith.constant dense<0.000000e+00> : vector<24x128xf32>
    %7 = tpu.matmul %3, %5, %cst {dimension_numbers = #tpu.dot_dimension_numbers<[1], [0], [0], [1], [0, 0, 1, 1], [], []>} : vector<24x128xf32>, vector<128x128xf32>, vector<24x128xf32> -> vector<24x128xf32>
    %cst_8 = arith.constant dense<0.000000e+00> : vector<24x128xf32>
    %8 = tpu.matmul %3, %6, %cst_8 {dimension_numbers = #tpu.dot_dimension_numbers<[1], [0], [0], [1], [0, 0, 1, 1], [], []>} : vector<24x128xf32>, vector<128x128xf32>, vector<24x128xf32> -> vector<24x128xf32>
    %cst_9 = arith.constant dense<0.000000e+00> : vector<24x128xf32>
    %9 = tpu.matmul %4, %5, %cst_9 {dimension_numbers = #tpu.dot_dimension_numbers<[1], [0], [0], [1], [0, 0, 1, 1], [], []>} : vector<24x128xf32>, vector<128x128xf32>, vector<24x128xf32> -> vector<24x128xf32>
    %cst_10 = arith.constant dense<0.000000e+00> : vector<24x128xf32>
    %10 = tpu.matmul %4, %6, %cst_10 {dimension_numbers = #tpu.dot_dimension_numbers<[1], [0], [0], [1], [0, 0, 1, 1], [], []>} : vector<24x128xf32>, vector<128x128xf32>, vector<24x128xf32> -> vector<24x128xf32>
    %11 = arith.mulf %7, %7 : vector<24x128xf32>
    %12 = arith.mulf %8, %8 : vector<24x128xf32>
    %13 = arith.addf %11, %12 : vector<24x128xf32>
    %cst_11 = arith.constant 1.000000e-07 : f32
    %14 = vector.broadcast %cst_11 : f32 to vector<24x128xf32>
    %15 = arith.maximumf %13, %14 : vector<24x128xf32>
    %16 = math.sqrt %15 : vector<24x128xf32>
    %17 = arith.mulf %9, %9 : vector<24x128xf32>
    %18 = arith.mulf %10, %10 : vector<24x128xf32>
    %19 = arith.addf %17, %18 : vector<24x128xf32>
    %cst_12 = arith.constant 1.000000e-07 : f32
    %20 = vector.broadcast %cst_12 : f32 to vector<24x128xf32>
    %21 = arith.maximumf %19, %20 : vector<24x128xf32>
    %22 = math.sqrt %21 : vector<24x128xf32>
    %23 = tpu.iota {dimensions = array<i32: 0>} : vector<24x128xi32>
    %c24_i32 = arith.constant 24 : i32
    %24 = arith.muli %arg0, %c24_i32 : i32
    %25 = vector.broadcast %24 : i32 to vector<24x128xi32>
    %26 = arith.addi %23, %25 : vector<24x128xi32>
    %27 = tpu.iota {dimensions = array<i32: 1>} : vector<24x128xi32>
    %c18_i32 = arith.constant 18 : i32
    %28 = vector.broadcast %c18_i32 : i32 to vector<24x128xi32>
    %29 = arith.cmpi slt, %26, %28 : vector<24x128xi32>
    %c65_i32 = arith.constant 65 : i32
    %30 = vector.broadcast %c65_i32 : i32 to vector<24x128xi32>
    %31 = arith.cmpi slt, %27, %30 : vector<24x128xi32>
    %32 = arith.andi %29, %31 : vector<24x128xi1>
    %33 = arith.extui %32 : vector<24x128xi1> to vector<24x128xi32>
    %34 = arith.sitofp %33 : vector<24x128xi32> to vector<24x128xf32>
    %35 = arith.subf %22, %16 : vector<24x128xf32>
    %36 = arith.mulf %35, %35 : vector<24x128xf32>
    %37 = arith.mulf %36, %34 : vector<24x128xf32>
    %38 = vector.shape_cast %37 : vector<24x128xf32> to vector<1x24x128xf32>
    %cst_13 = arith.constant dense<0.000000e+00> : vector<1xf32>
    %39 = vector.multi_reduction <add>, %38, %cst_13 [1, 2] : vector<1x24x128xf32> to vector<1xf32>
    %40 = vector.shape_cast %39 : vector<1xf32> to vector<1x1x1xf32>
    %41 = vector.extract %40[0, 0, 0] : f32 from vector<1x1x1xf32>
    %42 = arith.mulf %22, %22 : vector<24x128xf32>
    %43 = arith.mulf %42, %34 : vector<24x128xf32>
    %44 = vector.shape_cast %43 : vector<24x128xf32> to vector<1x24x128xf32>
    %cst_14 = arith.constant dense<0.000000e+00> : vector<1xf32>
    %45 = vector.multi_reduction <add>, %44, %cst_14 [1, 2] : vector<1x24x128xf32> to vector<1xf32>
    %46 = vector.shape_cast %45 : vector<1xf32> to vector<1x1x1xf32>
    %47 = vector.extract %46[0, 0, 0] : f32 from vector<1x1x1xf32>
    %48 = math.log %22 : vector<24x128xf32>
    %49 = math.log %16 : vector<24x128xf32>
    %50 = arith.subf %48, %49 : vector<24x128xf32>
    %51 = math.absf %50 : vector<24x128xf32>
    %52 = arith.mulf %51, %34 : vector<24x128xf32>
    %53 = vector.shape_cast %52 : vector<24x128xf32> to vector<1x24x128xf32>
    %cst_15 = arith.constant dense<0.000000e+00> : vector<1xf32>
    %54 = vector.multi_reduction <add>, %53, %cst_15 [1, 2] : vector<1x24x128xf32> to vector<1xf32>
    %55 = vector.shape_cast %54 : vector<1xf32> to vector<1x1x1xf32>
    %56 = vector.extract %55[0, 0, 0] : f32 from vector<1x1x1xf32>
    %57 = tpu.iota {dimensions = array<i32: 1>} : vector<1x128xi32>
    %c0_i32_16 = arith.constant 0 : i32
    %58 = vector.broadcast %c0_i32_16 : i32 to vector<1x128xi32>
    %59 = arith.cmpi eq, %57, %58 : vector<1x128xi32>
    %cst_17 = arith.constant 0.000000e+00 : f32
    %60 = vector.broadcast %41 : f32 to vector<1x128xf32>
    %61 = vector.broadcast %cst_17 : f32 to vector<1x128xf32>
    %62 = arith.select %59, %60, %61 : vector<1x128xi1>, vector<1x128xf32>
    %c1_i32 = arith.constant 1 : i32
    %63 = vector.broadcast %c1_i32 : i32 to vector<1x128xi32>
    %64 = arith.cmpi eq, %57, %63 : vector<1x128xi32>
    %cst_18 = arith.constant 0.000000e+00 : f32
    %65 = vector.broadcast %47 : f32 to vector<1x128xf32>
    %66 = vector.broadcast %cst_18 : f32 to vector<1x128xf32>
    %67 = arith.select %64, %65, %66 : vector<1x128xi1>, vector<1x128xf32>
    %68 = arith.addf %62, %67 : vector<1x128xf32>
    %c2_i32 = arith.constant 2 : i32
    %69 = vector.broadcast %c2_i32 : i32 to vector<1x128xi32>
    %70 = arith.cmpi eq, %57, %69 : vector<1x128xi32>
    %cst_19 = arith.constant 0.000000e+00 : f32
    %71 = vector.broadcast %56 : f32 to vector<1x128xf32>
    %72 = vector.broadcast %cst_19 : f32 to vector<1x128xf32>
    %73 = arith.select %70, %71, %72 : vector<1x128xi1>, vector<1x128xf32>
    %74 = arith.addf %68, %73 : vector<1x128xf32>
    %c0_20 = arith.constant 0 : index
    %c0_21 = arith.constant 0 : index
    %75 = vector.load %arg5[%c0_20, %c0_21] : memref<1x128xf32, #tpu.memory_space<vmem>>, vector<1x128xf32>
    %76 = arith.addf %75, %74 : vector<1x128xf32>
    %c0_22 = arith.constant 0 : index
    %c0_23 = arith.constant 0 : index
    %77 = vector.load %arg5[%c0_22, %c0_23] : memref<1x128xf32, #tpu.memory_space<vmem>>, vector<1x128xf32>
    tpu.vector_store %arg5[%c0_22, %c0_23], %76 {strides = array<i32>} : memref<1x128xf32, #tpu.memory_space<vmem>>, vector<1x128xf32>,
    return
  }
  func.func @transform_0(%arg0: i32) -> (i32, i32) {
    %c0_i32 = arith.constant 0 : i32
    %c0_i32_0 = arith.constant 0 : i32
    return %arg0, %c0_i32 : i32, i32
  }
  func.func @transform_1(%arg0: i32) -> (i32, i32) {
    %c0_i32 = arith.constant 0 : i32
    %c0_i32_0 = arith.constant 0 : i32
    return %arg0, %c0_i32 : i32, i32
  }
  func.func @transform_2(%arg0: i32) -> (i32, i32) {
    %c0_i32 = arith.constant 0 : i32
    %c0_i32_0 = arith.constant 0 : i32
    %c0_i32_1 = arith.constant 0 : i32
    return %c0_i32, %c0_i32_0 : i32, i32
  }
  func.func @transform_3(%arg0: i32) -> (i32, i32) {
    %c0_i32 = arith.constant 0 : i32
    %c0_i32_0 = arith.constant 0 : i32
    %c0_i32_1 = arith.constant 0 : i32
    return %c0_i32, %c0_i32_0 : i32, i32
  }
  func.func @transform_4(%arg0: i32) -> (i32, i32) {
    %c0_i32 = arith.constant 0 : i32
    %c0_i32_0 = arith.constant 0 : i32
    %c0_i32_1 = arith.constant 0 : i32
    return %c0_i32, %c0_i32_0 : i32, i32
  }
}

module attributes {stable_mosaic.version = 11 : i64} {
  func.func @_stft_loss_kernel(%arg0: i32, %arg1: memref<40x64xf32, #tpu.memory_space<vmem>>, %arg2: memref<40x64xf32, #tpu.memory_space<vmem>>, %arg3: memref<64x128xf32, #tpu.memory_space<vmem>>, %arg4: memref<64x128xf32, #tpu.memory_space<vmem>>, %arg5: memref<1x128xf32, #tpu.memory_space<vmem>>) attributes {dimension_semantics = [#tpu.dimension_semantics<arbitrary>], iteration_bounds = array<i64: 1>, scalar_prefetch = 0 : i64, scratch_operands = 0 : i64, tpu.core_type = #tpu.core_type<tc>, window_params = [{transform_indices = @transform_0, window_bounds = array<i64: 40, 64>}, {transform_indices = @transform_1, window_bounds = array<i64: 40, 64>}, {pipeline_mode = #tpu.pipeline_mode<synchronous>, transform_indices = @transform_2, window_bounds = array<i64: 64, 128>}, {pipeline_mode = #tpu.pipeline_mode<synchronous>, transform_indices = @transform_3, window_bounds = array<i64: 64, 128>}, {pipeline_mode = #tpu.pipeline_mode<synchronous>, transform_indices = @transform_4, window_bounds = array<i64: 1, 128>}]} {
    %c0_i32 = arith.constant 0 : i32
    %0 = arith.cmpi eq, %arg0, %c0_i32 : i32
    %1 = arith.extui %0 : i1 to i32
    %c0_i32_0 = arith.constant 0 : i32
    %2 = arith.cmpi ne, %1, %c0_i32_0 : i32
    scf.if %2 {
      %cst_24 = arith.constant 0.000000e+00 : f32
      %78 = vector.broadcast %cst_24 : f32 to vector<1x128xf32>
      %c0_25 = arith.constant 0 : index
      %c0_26 = arith.constant 0 : index
      %79 = vector.load %arg5[%c0_25, %c0_26] : memref<1x128xf32, #tpu.memory_space<vmem>>, vector<1x128xf32>
      tpu.vector_store %arg5[%c0_25, %c0_26], %78 {strides = array<i32>} : memref<1x128xf32, #tpu.memory_space<vmem>>, vector<1x128xf32>,
    } else {
    }
    %c0 = arith.constant 0 : index
    %c0_1 = arith.constant 0 : index
    %3 = vector.load %arg1[%c0, %c0_1] : memref<40x64xf32, #tpu.memory_space<vmem>>, vector<40x64xf32>
    %c0_2 = arith.constant 0 : index
    %c0_3 = arith.constant 0 : index
    %4 = vector.load %arg2[%c0_2, %c0_3] : memref<40x64xf32, #tpu.memory_space<vmem>>, vector<40x64xf32>
    %c0_4 = arith.constant 0 : index
    %c0_5 = arith.constant 0 : index
    %5 = vector.load %arg3[%c0_4, %c0_5] : memref<64x128xf32, #tpu.memory_space<vmem>>, vector<64x128xf32>
    %c0_6 = arith.constant 0 : index
    %c0_7 = arith.constant 0 : index
    %6 = vector.load %arg4[%c0_6, %c0_7] : memref<64x128xf32, #tpu.memory_space<vmem>>, vector<64x128xf32>
    %cst = arith.constant dense<0.000000e+00> : vector<40x128xf32>
    %7 = tpu.matmul %3, %5, %cst {dimension_numbers = #tpu.dot_dimension_numbers<[1], [0], [0], [1], [0, 0, 1, 1], [], []>} : vector<40x64xf32>, vector<64x128xf32>, vector<40x128xf32> -> vector<40x128xf32>
    %cst_8 = arith.constant dense<0.000000e+00> : vector<40x128xf32>
    %8 = tpu.matmul %3, %6, %cst_8 {dimension_numbers = #tpu.dot_dimension_numbers<[1], [0], [0], [1], [0, 0, 1, 1], [], []>} : vector<40x64xf32>, vector<64x128xf32>, vector<40x128xf32> -> vector<40x128xf32>
    %cst_9 = arith.constant dense<0.000000e+00> : vector<40x128xf32>
    %9 = tpu.matmul %4, %5, %cst_9 {dimension_numbers = #tpu.dot_dimension_numbers<[1], [0], [0], [1], [0, 0, 1, 1], [], []>} : vector<40x64xf32>, vector<64x128xf32>, vector<40x128xf32> -> vector<40x128xf32>
    %cst_10 = arith.constant dense<0.000000e+00> : vector<40x128xf32>
    %10 = tpu.matmul %4, %6, %cst_10 {dimension_numbers = #tpu.dot_dimension_numbers<[1], [0], [0], [1], [0, 0, 1, 1], [], []>} : vector<40x64xf32>, vector<64x128xf32>, vector<40x128xf32> -> vector<40x128xf32>
    %11 = arith.mulf %7, %7 : vector<40x128xf32>
    %12 = arith.mulf %8, %8 : vector<40x128xf32>
    %13 = arith.addf %11, %12 : vector<40x128xf32>
    %cst_11 = arith.constant 1.000000e-07 : f32
    %14 = vector.broadcast %cst_11 : f32 to vector<40x128xf32>
    %15 = arith.maximumf %13, %14 : vector<40x128xf32>
    %16 = math.sqrt %15 : vector<40x128xf32>
    %17 = arith.mulf %9, %9 : vector<40x128xf32>
    %18 = arith.mulf %10, %10 : vector<40x128xf32>
    %19 = arith.addf %17, %18 : vector<40x128xf32>
    %cst_12 = arith.constant 1.000000e-07 : f32
    %20 = vector.broadcast %cst_12 : f32 to vector<40x128xf32>
    %21 = arith.maximumf %19, %20 : vector<40x128xf32>
    %22 = math.sqrt %21 : vector<40x128xf32>
    %23 = tpu.iota {dimensions = array<i32: 0>} : vector<40x128xi32>
    %c40_i32 = arith.constant 40 : i32
    %24 = arith.muli %arg0, %c40_i32 : i32
    %25 = vector.broadcast %24 : i32 to vector<40x128xi32>
    %26 = arith.addi %23, %25 : vector<40x128xi32>
    %27 = tpu.iota {dimensions = array<i32: 1>} : vector<40x128xi32>
    %c34_i32 = arith.constant 34 : i32
    %28 = vector.broadcast %c34_i32 : i32 to vector<40x128xi32>
    %29 = arith.cmpi slt, %26, %28 : vector<40x128xi32>
    %c33_i32 = arith.constant 33 : i32
    %30 = vector.broadcast %c33_i32 : i32 to vector<40x128xi32>
    %31 = arith.cmpi slt, %27, %30 : vector<40x128xi32>
    %32 = arith.andi %29, %31 : vector<40x128xi1>
    %33 = arith.extui %32 : vector<40x128xi1> to vector<40x128xi32>
    %34 = arith.sitofp %33 : vector<40x128xi32> to vector<40x128xf32>
    %35 = arith.subf %22, %16 : vector<40x128xf32>
    %36 = arith.mulf %35, %35 : vector<40x128xf32>
    %37 = arith.mulf %36, %34 : vector<40x128xf32>
    %38 = vector.shape_cast %37 : vector<40x128xf32> to vector<1x40x128xf32>
    %cst_13 = arith.constant dense<0.000000e+00> : vector<1xf32>
    %39 = vector.multi_reduction <add>, %38, %cst_13 [1, 2] : vector<1x40x128xf32> to vector<1xf32>
    %40 = vector.shape_cast %39 : vector<1xf32> to vector<1x1x1xf32>
    %41 = vector.extract %40[0, 0, 0] : f32 from vector<1x1x1xf32>
    %42 = arith.mulf %22, %22 : vector<40x128xf32>
    %43 = arith.mulf %42, %34 : vector<40x128xf32>
    %44 = vector.shape_cast %43 : vector<40x128xf32> to vector<1x40x128xf32>
    %cst_14 = arith.constant dense<0.000000e+00> : vector<1xf32>
    %45 = vector.multi_reduction <add>, %44, %cst_14 [1, 2] : vector<1x40x128xf32> to vector<1xf32>
    %46 = vector.shape_cast %45 : vector<1xf32> to vector<1x1x1xf32>
    %47 = vector.extract %46[0, 0, 0] : f32 from vector<1x1x1xf32>
    %48 = math.log %22 : vector<40x128xf32>
    %49 = math.log %16 : vector<40x128xf32>
    %50 = arith.subf %48, %49 : vector<40x128xf32>
    %51 = math.absf %50 : vector<40x128xf32>
    %52 = arith.mulf %51, %34 : vector<40x128xf32>
    %53 = vector.shape_cast %52 : vector<40x128xf32> to vector<1x40x128xf32>
    %cst_15 = arith.constant dense<0.000000e+00> : vector<1xf32>
    %54 = vector.multi_reduction <add>, %53, %cst_15 [1, 2] : vector<1x40x128xf32> to vector<1xf32>
    %55 = vector.shape_cast %54 : vector<1xf32> to vector<1x1x1xf32>
    %56 = vector.extract %55[0, 0, 0] : f32 from vector<1x1x1xf32>
    %57 = tpu.iota {dimensions = array<i32: 1>} : vector<1x128xi32>
    %c0_i32_16 = arith.constant 0 : i32
    %58 = vector.broadcast %c0_i32_16 : i32 to vector<1x128xi32>
    %59 = arith.cmpi eq, %57, %58 : vector<1x128xi32>
    %cst_17 = arith.constant 0.000000e+00 : f32
    %60 = vector.broadcast %41 : f32 to vector<1x128xf32>
    %61 = vector.broadcast %cst_17 : f32 to vector<1x128xf32>
    %62 = arith.select %59, %60, %61 : vector<1x128xi1>, vector<1x128xf32>
    %c1_i32 = arith.constant 1 : i32
    %63 = vector.broadcast %c1_i32 : i32 to vector<1x128xi32>
    %64 = arith.cmpi eq, %57, %63 : vector<1x128xi32>
    %cst_18 = arith.constant 0.000000e+00 : f32
    %65 = vector.broadcast %47 : f32 to vector<1x128xf32>
    %66 = vector.broadcast %cst_18 : f32 to vector<1x128xf32>
    %67 = arith.select %64, %65, %66 : vector<1x128xi1>, vector<1x128xf32>
    %68 = arith.addf %62, %67 : vector<1x128xf32>
    %c2_i32 = arith.constant 2 : i32
    %69 = vector.broadcast %c2_i32 : i32 to vector<1x128xi32>
    %70 = arith.cmpi eq, %57, %69 : vector<1x128xi32>
    %cst_19 = arith.constant 0.000000e+00 : f32
    %71 = vector.broadcast %56 : f32 to vector<1x128xf32>
    %72 = vector.broadcast %cst_19 : f32 to vector<1x128xf32>
    %73 = arith.select %70, %71, %72 : vector<1x128xi1>, vector<1x128xf32>
    %74 = arith.addf %68, %73 : vector<1x128xf32>
    %c0_20 = arith.constant 0 : index
    %c0_21 = arith.constant 0 : index
    %75 = vector.load %arg5[%c0_20, %c0_21] : memref<1x128xf32, #tpu.memory_space<vmem>>, vector<1x128xf32>
    %76 = arith.addf %75, %74 : vector<1x128xf32>
    %c0_22 = arith.constant 0 : index
    %c0_23 = arith.constant 0 : index
    %77 = vector.load %arg5[%c0_22, %c0_23] : memref<1x128xf32, #tpu.memory_space<vmem>>, vector<1x128xf32>
    tpu.vector_store %arg5[%c0_22, %c0_23], %76 {strides = array<i32>} : memref<1x128xf32, #tpu.memory_space<vmem>>, vector<1x128xf32>,
    return
  }
  func.func @transform_0(%arg0: i32) -> (i32, i32) {
    %c0_i32 = arith.constant 0 : i32
    %c0_i32_0 = arith.constant 0 : i32
    return %arg0, %c0_i32 : i32, i32
  }
  func.func @transform_1(%arg0: i32) -> (i32, i32) {
    %c0_i32 = arith.constant 0 : i32
    %c0_i32_0 = arith.constant 0 : i32
    return %arg0, %c0_i32 : i32, i32
  }
  func.func @transform_2(%arg0: i32) -> (i32, i32) {
    %c0_i32 = arith.constant 0 : i32
    %c0_i32_0 = arith.constant 0 : i32
    %c0_i32_1 = arith.constant 0 : i32
    return %c0_i32, %c0_i32_0 : i32, i32
  }
  func.func @transform_3(%arg0: i32) -> (i32, i32) {
    %c0_i32 = arith.constant 0 : i32
    %c0_i32_0 = arith.constant 0 : i32
    %c0_i32_1 = arith.constant 0 : i32
    return %c0_i32, %c0_i32_0 : i32, i32
  }
  func.func @transform_4(%arg0: i32) -> (i32, i32) {
    %c0_i32 = arith.constant 0 : i32
    %c0_i32_0 = arith.constant 0 : i32
    %c0_i32_1 = arith.constant 0 : i32
    return %c0_i32, %c0_i32_0 : i32, i32
  }
}

</mosaic_0001>

<bundles_post_ra>
// kernel: loss_fn.2
= control target key start
LH: loop header
LB: loop body
LE: loop exit
PB: predicated region body
PF: predicated region fallthrough
CT: control target
= control target key end

     0   :  { %s626_s2 = inlined_call_operand.vmem [shape: f32[128,128], index: 2, kind: input, shape index: {}]   ;;  %s627_s3 = inlined_call_operand.vmem [shape: f32[128,128], index: 3, kind: input, shape index: {}]   ;;  %s628_s0 = inlined_call_operand.vmem [shape: f32[24,128], index: 0, kind: input, shape index: {}]   ;;  %s629_s1 = inlined_call_operand.vmem [shape: f32[24,128], index: 1, kind: input, shape index: {}]   ;;  %s630_s4 = inlined_call_operand.vmem [shape: f32[1,128], index: 4, kind: output, shape index: {}]  }
   0x1   :  { %v43_v0 = vld [vmem:[%s626_s2 + $0x78] sm:$0xff]  ;;  %v42_v2 = vld [vmem:[%s626_s2 + $0x70] sm:$0xff]  ;;  %v41_v4 = vld [vmem:[%s626_s2 + $0x68] sm:$0xff] }
   0x2   :  { %v59_v1 = vld [vmem:[%s627_s3 + $0x78] sm:$0xff]  ;;  %60 = vmatpush.msra.mxu0 %v43_v0  ;;  %v58_v3 = vld [vmem:[%s627_s3 + $0x70] sm:$0xff]  ;;  %112 = vmatpush.msra.mxu2 %v43_v0  ;;  %v57_v5 = vld [vmem:[%s627_s3 + $0x68] sm:$0xff] }
   0x3   :  { %86 = vmatpush.msra.mxu1 %v59_v1  ;;  %138 = vmatpush.msra.mxu3 %v59_v1  ;;  %v40_v6 = vld [vmem:[%s626_s2 + $0x60] sm:$0xff]  ;;  %v39_v8 = vld [vmem:[%s626_s2 + $0x58] sm:$0xff]  ;;  %v38_v10 = vld [vmem:[%s626_s2 + $0x50] sm:$0xff] }
   0x4   :  { %61 = vmatpush.msra.mxu0 %v42_v2  ;;  %113 = vmatpush.msra.mxu2 %v42_v2  ;;  %v56_v7 = vld [vmem:[%s627_s3 + $0x60] sm:$0xff]  ;;  %v55_v9 = vld [vmem:[%s627_s3 + $0x58] sm:$0xff]  ;;  %v54_v11 = vld [vmem:[%s627_s3 + $0x50] sm:$0xff] }
   0x5   :  { %87 = vmatpush.msra.mxu1 %v58_v3  ;;  %139 = vmatpush.msra.mxu3 %v58_v3  ;;  %v37_v12 = vld [vmem:[%s626_s2 + $0x48] sm:$0xff]  ;;  %v36_v14 = vld [vmem:[%s626_s2 + $0x40] sm:$0xff]  ;;  %v35_v16 = vld [vmem:[%s626_s2 + $0x38] sm:$0xff] }
   0x6   :  { %62 = vmatpush.msra.mxu0 %v41_v4  ;;  %114 = vmatpush.msra.mxu2 %v41_v4  ;;  %v53_v13 = vld [vmem:[%s627_s3 + $0x48] sm:$0xff]  ;;  %v52_v15 = vld [vmem:[%s627_s3 + $0x40] sm:$0xff]  ;;  %v51_v17 = vld [vmem:[%s627_s3 + $0x38] sm:$0xff] }
   0x7   :  { %88 = vmatpush.msra.mxu1 %v57_v5  ;;  %140 = vmatpush.msra.mxu3 %v57_v5  ;;  %v34_v18 = vld [vmem:[%s626_s2 + $0x30] sm:$0xff]  ;;  %v33_v20 = vld [vmem:[%s626_s2 + $0x28] sm:$0xff]  ;;  %v32_v22 = vld [vmem:[%s626_s2 + $0x20] sm:$0xff] }
   0x8   :  { %63 = vmatpush.msra.mxu0 %v40_v6  ;;  %115 = vmatpush.msra.mxu2 %v40_v6  ;;  %v50_v19 = vld [vmem:[%s627_s3 + $0x30] sm:$0xff]  ;;  %v49_v21 = vld [vmem:[%s627_s3 + $0x28] sm:$0xff]  ;;  %v48_v23 = vld [vmem:[%s627_s3 + $0x20] sm:$0xff] }
   0x9   :  { %89 = vmatpush.msra.mxu1 %v56_v7  ;;  %141 = vmatpush.msra.mxu3 %v56_v7  ;;  %v31_v24 = vld [vmem:[%s626_s2 + $0x18] sm:$0xff]  ;;  %v30_v26 = vld [vmem:[%s626_s2 + $0x10] sm:$0xff]  ;;  %v29_v28 = vld [vmem:[%s626_s2 + $0x8] sm:$0xff] }
   0xa   :  { %64 = vmatpush.msra.mxu0 %v39_v8  ;;  %116 = vmatpush.msra.mxu2 %v39_v8  ;;  %v47_v25 = vld [vmem:[%s627_s3 + $0x18] sm:$0xff]  ;;  %v46_v27 = vld [vmem:[%s627_s3 + $0x10] sm:$0xff]  ;;  %v45_v29 = vld [vmem:[%s627_s3 + $0x8] sm:$0xff] }
   0xb   :  { %90 = vmatpush.msra.mxu1 %v55_v9  ;;  %142 = vmatpush.msra.mxu3 %v55_v9  ;;  %v28_v30 = vld [vmem:[%s626_s2] sm:$0xff]  ;;  %v23_v34 = vld [vmem:[%s628_s0 + $0x8] sm:$0xff]  ;;  %v24_v36 = vld [vmem:[%s628_s0 + $0x10] sm:$0xff] }
   0xc   :  { %65 = vmatpush.msra.mxu0 %v38_v10  ;;  %117 = vmatpush.msra.mxu2 %v38_v10  ;;  %v44_v31 = vld [vmem:[%s627_s3] sm:$0xff]  ;;  %v26_v35 = vld [vmem:[%s629_s1 + $0x8] sm:$0xff]  ;;  %v27_v37 = vld [vmem:[%s629_s1 + $0x10] sm:$0xff] }
   0xd   :  { %91 = vmatpush.msra.mxu1 %v54_v11  ;;  %143 = vmatpush.msra.mxu3 %v54_v11  ;;  %v22_v32 = vld [vmem:[%s628_s0] sm:$0xff] }
   0xe   :  { %66 = vmatpush.msra.mxu0 %v37_v12  ;;  %118 = vmatpush.msra.mxu2 %v37_v12  ;;  %v25_v33 = vld [vmem:[%s629_s1] sm:$0xff] }
   0xf   :  { %92 = vmatpush.msra.mxu1 %v53_v13  ;;  %144 = vmatpush.msra.mxu3 %v53_v13 }
  0x10   :  { %67 = vmatpush.msra.mxu0 %v36_v14  ;;  %119 = vmatpush.msra.mxu2 %v36_v14 }
  0x11   :  { %93 = vmatpush.msra.mxu1 %v52_v15  ;;  %145 = vmatpush.msra.mxu3 %v52_v15 }
  0x12   :  { %68 = vmatpush.msra.mxu0 %v35_v16  ;;  %120 = vmatpush.msra.mxu2 %v35_v16 }
  0x13   :  { %94 = vmatpush.msra.mxu1 %v51_v17  ;;  %146 = vmatpush.msra.mxu3 %v51_v17 }
  0x14   :  { %69 = vmatpush.msra.mxu0 %v34_v18  ;;  %121 = vmatpush.msra.mxu2 %v34_v18 }
  0x15   :  { %95 = vmatpush.msra.mxu1 %v50_v19  ;;  %147 = vmatpush.msra.mxu3 %v50_v19 }
  0x16   :  { %70 = vmatpush.msra.mxu0 %v33_v20  ;;  %122 = vmatpush.msra.mxu2 %v33_v20 }
  0x17   :  { %96 = vmatpush.msra.mxu1 %v49_v21  ;;  %148 = vmatpush.msra.mxu3 %v49_v21 }
  0x18   :  { %71 = vmatpush.msra.mxu0 %v32_v22  ;;  %123 = vmatpush.msra.mxu2 %v32_v22 }
  0x19   :  { %97 = vmatpush.msra.mxu1 %v48_v23  ;;  %149 = vmatpush.msra.mxu3 %v48_v23 }
  0x1a   :  { %72 = vmatpush.msra.mxu0 %v31_v24  ;;  %124 = vmatpush.msra.mxu2 %v31_v24 }
  0x1b   :  { %98 = vmatpush.msra.mxu1 %v47_v25  ;;  %150 = vmatpush.msra.mxu3 %v47_v25 }
  0x1c   :  { %73 = vmatpush.msra.mxu0 %v30_v26  ;;  %125 = vmatpush.msra.mxu2 %v30_v26 }
  0x1d   :  { %99 = vmatpush.msra.mxu1 %v46_v27  ;;  %151 = vmatpush.msra.mxu3 %v46_v27 }
  0x1e   :  { %74 = vmatpush.msra.mxu0 %v29_v28  ;;  %126 = vmatpush.msra.mxu2 %v29_v28 }
  0x1f   :  { %100 = vmatpush.msra.mxu1 %v45_v29  ;;  %152 = vmatpush.msra.mxu3 %v45_v29 }
  0x20   :  { %75 = vmatpush.msra.mxu0 %v28_v30  ;;  %127 = vmatpush.msra.mxu2 %v28_v30 }
  0x21   :  { %101 = vmatpush.msra.mxu1 %v44_v31  ;;  %153 = vmatpush.msra.mxu3 %v44_v31 }
  0x22   :  { %76 = vmatmul.f32.vlgmr.msra.gmra.mxu0 %v22_v32  ;;  %102 = vmatmul.f32.vlgmr.msra.gmra.mxu1 %v22_v32 }
  0x23   :  { %128 = vmatmul.f32.vlgmr.msra.gmra.mxu2 %v25_v33  ;;  %154 = vmatmul.f32.vlgmr.msra.gmra.mxu3 %v25_v33 }
  0x2a   :  { %79 = vmatmul.f32.gmra.mxu0 %v23_v34  ;;  %105 = vmatmul.f32.gmra.mxu1 %v23_v34 }
  0x2b   :  { %131 = vmatmul.f32.gmra.mxu2 %v26_v35  ;;  %157 = vmatmul.f32.gmra.mxu3 %v26_v35 }
  0x32   :  { %82 = vmatmul.f32.gmra.mxu0 %v24_v36  ;;  %108 = vmatmul.f32.gmra.mxu1 %v24_v36 }
  0x33   :  { %134 = vmatmul.f32.gmra.mxu2 %v27_v37  ;;  %160 = vmatmul.f32.gmra.mxu3 %v27_v37  ;;  %v260_v37 = vlaneseq }
  0x9f   :  { %v77_v38 = vpop.f32.mrf.mxu0  ;;  %v103_v39 = vpop.f32.mrf.mxu1 }
  0xa0   :  { %v164_v40 = vmul.f32 %v77_v38, %v77_v38  ;;  %v167_v41 = vmul.f32 %v103_v39, %v103_v39 }
  0xa2   :  { %v170_v42 = vadd.f32 %v167_v41, %v164_v40 }
  0xa4   :  { %v545_v43 = vmax.f32 %v170_v42, 1e-07 }
  0xa6   :  { %381 = vrsqrt.f32 %v545_v43  ;;  %v129_v44 = vpop.f32.mrf.mxu2  ;;  %v155_v45 = vpop.f32.mrf.mxu3  ;;  %vm183_vm0 = vcmp.eq.f32.partialorder %v545_v43, inf  ;;  %vm185_vm2 = vcmp.eq.f32.partialorder %v545_v43, 0.0  ;;  %v186_v40 = vand.u32 2147483648, %v545_v43 }
  0xa7   :  { %v212_v46 = vmul.f32 %v129_v44, %v129_v44  ;;  %v215_v47 = vmul.f32 %v155_v45, %v155_v45  ;;  %v80_v48 = vpop.f32.mrf.mxu0  ;;  %v106_v49 = vpop.f32.mrf.mxu1 }
  0xa8   :  { %v165_v50 = vmul.f32 %v80_v48, %v80_v48  ;;  %v168_v51 = vmul.f32 %v106_v49, %v106_v49 }
  0xa9   :  { %v218_v52 = vadd.f32 %v215_v47, %v212_v46 }
  0xaa   :  { %v171_v53 = vadd.f32 %v168_v51, %v165_v50 }
  0xab   :  { %v548_v54 = vmax.f32 %v218_v52, 1e-07 }
  0xac   :  { %v382_v55 = vpop.eup %381  ;;  %v550_v56 = vmax.f32 %v171_v53, 1e-07 }
  0xad   :  { %383 = vrsqrt.f32 %v548_v54  ;;  %v177_v57 = vmul.f32 %v382_v55, %v545_v43  ;;  %vm231_vm1 = vcmp.eq.f32.partialorder %v548_v54, inf  ;;  %vm233_vm4 = vcmp.eq.f32.partialorder %v548_v54, 0.0 }
  0xae   :  { %385 = vrsqrt.f32 %v550_v56  ;;  %v132_v58 = vpop.f32.mrf.mxu2  ;;  %v158_v59 = vpop.f32.mrf.mxu3  ;;  %vm195_vm3 = vcmp.eq.f32.partialorder %v550_v56, inf  ;;  %v234_v46 = vand.u32 2147483648, %v548_v54  ;;  %vm197_vm5 = vcmp.eq.f32.partialorder %v550_v56, 0.0 }
  0xaf   :  { %v213_v60 = vmul.f32 %v132_v58, %v132_v58  ;;  %v216_v61 = vmul.f32 %v158_v59, %v158_v59  ;;  %v83_v62 = vpop.f32.mrf.mxu0  ;;  %v109_v63 = vpop.f32.mrf.mxu1  ;;  %v178_v2 = vmul.f32 %v382_v55, %v177_v57  ;;  %v198_v51 = vand.u32 2147483648, %v550_v56 }
  0xb0   :  { %v166_v0 = vmul.f32 %v83_v62, %v83_v62  ;;  %v169_v1 = vmul.f32 %v109_v63, %v109_v63 }
  0xb1   :  { %v219_v3 = vadd.f32 %v216_v61, %v213_v60  ;;  %v179_v9 = vmul.f32 0.5, %v178_v2 }
  0xb2   :  { %v172_v4 = vadd.f32 %v169_v1, %v166_v0  ;;  %v596_v0 = vand.u32 127, %v260_v37 }
  0xb3   :  { %v384_v5 = vpop.eup %383  ;;  %v555_v6 = vmax.f32 %v219_v3, 1e-07  ;;  %v180_v17 = vsub.f32 1.5, %v179_v9 }
  0xb4   :  { %v386_v7 = vpop.eup %385  ;;  %v557_v8 = vmax.f32 %v172_v4, 1e-07  ;;  %v225_v10 = vmul.f32 %v384_v5, %v548_v54  ;;  %vm274_vm10 = vcmp.lt.s32.totalorder %v596_v0, 65  ;;  %vm353_vm15 = vcmp.eq.s32.totalorder %v596_v0, 0 }
  0xb5   :  { %387 = vrsqrt.f32 %v555_v6  ;;  %v189_v11 = vmul.f32 %v386_v7, %v550_v56  ;;  %v181_v26 = vmul.f32 %v382_v55, %v180_v17  ;;  %vm243_vm6 = vcmp.eq.f32.partialorder %v555_v6, inf }
  0xb6   :  { %389 = vrsqrt.f32 %v557_v8  ;;  %v135_v12 = vpop.f32.mrf.mxu2  ;;  %v161_v13 = vpop.f32.mrf.mxu3  ;;  %v226_v18 = vmul.f32 %v384_v5, %v225_v10  ;;  %vm245_vm7 = vcmp.eq.f32.partialorder %v555_v6, 0.0  ;;  %v246_v60 = vand.u32 2147483648, %v555_v6 }
  0xb7   :  { %v214_v14 = vmul.f32 %v135_v12, %v135_v12  ;;  %v217_v15 = vmul.f32 %v161_v13, %v161_v13  ;;  %v190_v16 = vmul.f32 %v386_v7, %v189_v11  ;;  %v182_v34 = vmul.f32 %v181_v26, %v545_v43 }
  0xb8   :  { %v227_v21 = vmul.f32 0.5, %v226_v18  ;;  %vm207_vm8 = vcmp.eq.f32.partialorder %v557_v8, inf  ;;  %v210_v3 = vand.u32 2147483648, %v557_v8  ;;  %vm209_vm9 = vcmp.eq.f32.partialorder %v557_v8, 0.0 }
  0xb9   :  { %v220_v19 = vadd.f32 %v217_v15, %v214_v14  ;;  %v191_v20 = vmul.f32 0.5, %v190_v16  ;;  %v184_v47 = vsel %vm183_vm0, %v545_v43, %v182_v34  ;;  %v405_v17 = vmov 0.0  }
  0xba   :  { %v228_v27 = vsub.f32 1.5, %v227_v21  ;;  %v187_v58 = vsel %vm185_vm2, %v186_v40, %v184_v47  ;;  %v371_v18 = vsel %vm274_vm10, 1.0, %v405_v17  ;;  %21 = vst [vmem:[%s630_s4] sm:$0x1] %v405_v17  ;;  %vm356_vm0 = vcmp.eq.s32.totalorder %v596_v0, 1 }
  0xbb   :  { %v388_v22 = vpop.eup %387  ;;  %v563_v23 = vmax.f32 %v220_v19, 1e-07  ;;  %v192_v24 = vsub.f32 1.5, %v191_v20 }
  0xbc   :  { %v390_v25 = vpop.eup %389  ;;  %v237_v28 = vmul.f32 %v388_v22, %v555_v6  ;;  %v229_v31 = vmul.f32 %v384_v5, %v228_v27 }
  0xbd   :  { %391 = vrsqrt.f32 %v563_v23  ;;  %v193_v29 = vmul.f32 %v386_v7, %v192_v24  ;;  %v201_v30 = vmul.f32 %v390_v25, %v557_v8  ;;  %vm255_vm11 = vcmp.eq.f32.partialorder %v563_v23, inf }
  0xbe   :  { %v238_v32 = vmul.f32 %v388_v22, %v237_v28  ;;  %v230_v35 = vmul.f32 %v229_v31, %v548_v54  ;;  %v258_v12 = vand.u32 2147483648, %v563_v23  ;;  %vm257_vm13 = vcmp.eq.f32.partialorder %v563_v23, 0.0 }
  0xbf   :  { %v202_v33 = vmul.f32 %v390_v25, %v201_v30  ;;  %v194_v38 = vmul.f32 %v193_v29, %v550_v56 }
  0xc0   :  { %v239_v36 = vmul.f32 0.5, %v238_v32  ;;  %v232_v41 = vsel %vm231_vm1, %v548_v54, %v230_v35  ;;  %v261_v54 = vshrl.u32 %v260_v37, 7  ;;  %vm360_vm1 = vcmp.eq.s32.totalorder %v596_v0, 2 }
  0xc1   :  { %v203_v39 = vmul.f32 0.5, %v202_v33  ;;  %v196_v50 = vsel %vm195_vm3, %v550_v56, %v194_v38  ;;  %v584_v53 = vsel %vm233_vm4, %v234_v46, %v232_v41 }
  0xc2   :  { %v240_v42 = vsub.f32 1.5, %v239_v36  ;;  %v199_v61 = vsel %vm197_vm5, %v198_v51, %v196_v50  ;;  %393 = vlog2.f32 %v584_v53  ;;  %v263_v4 = vadd.s32 16, %v261_v54 }
  0xc3   :  { %v392_v44 = vpop.eup %391  ;;  %v204_v45 = vsub.f32 1.5, %v203_v39  ;;  %395 = vlog2.f32 %v187_v58  ;;  %v304_v37 = vmul.f32 %v584_v53, %v584_v53 }
  0xc4   :  { %v241_v48 = vmul.f32 %v388_v22, %v240_v42  ;;  %v249_v49 = vmul.f32 %v392_v44, %v563_v23  ;;  %397 = vlog2.f32 %v199_v61  ;;  %vm273_vm12 = vcmp.lt.s32.totalorder %v263_v4, 18 }
  0xc5   :  { %v205_v52 = vmul.f32 %v390_v25, %v204_v45  ;;  %vm277_vm14 = vmand %vm273_vm12, %vm274_vm10  ;;  %v307_v47 = vmul.f32 %v371_v18, %v304_v37 }
  0xc6   :  { %v242_v55 = vmul.f32 %v241_v48, %v555_v6  ;;  %v250_v57 = vmul.f32 %v392_v44, %v249_v49  ;;  %v373_v28 = vsel %vm277_vm14, 1.0, %v405_v17 }
  0xc7   :  { %v206_v59 = vmul.f32 %v205_v52, %v557_v8 }
  0xc8   :  { %v244_v56 = vsel %vm243_vm6, %v555_v6, %v242_v55  ;;  %v251_v62 = vmul.f32 0.5, %v250_v57  ;;  %v284_v6 = vsub.f32 %v584_v53, %v187_v58  ;;  %v394_v9 = vpop.eup %393 }
  0xc9   :  { %v247_v63 = vsel %vm245_vm7, %v246_v60, %v244_v56  ;;  %v208_v43 = vsel %vm207_vm8, %v557_v8, %v206_v59  ;;  %v396_v13 = vpop.eup %395  ;;  %v322_v19 = vmul.f32 0.6931472, %v394_v9 }
  0xca   :  { %v252_v1 = vsub.f32 1.5, %v251_v62  ;;  %v285_v2 = vsub.f32 %v247_v63, %v199_v61  ;;  %v211_v7 = vsel %vm209_vm9, %v210_v3, %v208_v43  ;;  %399 = vlog2.f32 %v247_v63  ;;  %v398_v15 = vpop.eup %397 }
  0xcb   :  { %v287_v8 = vmul.f32 %v284_v6, %v284_v6  ;;  %401 = vlog2.f32 %v211_v7  ;;  %v328_v24 = vmul.f32 0.6931472, %v396_v13  ;;  %v330_v27 = vmul.f32 0.6931472, %v398_v15 }
  0xcc   :  { %v253_v5 = vmul.f32 %v392_v44, %v252_v1  ;;  %v288_v11 = vmul.f32 %v285_v2, %v285_v2  ;;  %v305_v33 = vmul.f32 %v247_v63, %v247_v63 }
  0xcd   :  { %v290_v26 = vmul.f32 %v371_v18, %v287_v8  ;;  %v333_v29 = vsub.f32 %v322_v19, %v328_v24 }
  0xce   :  { %v254_v10 = vmul.f32 %v253_v5, %v563_v23  ;;  %v291_v21 = vmul.f32 %v371_v18, %v288_v11  ;;  %v308_v44 = vmul.f32 %v371_v18, %v305_v33 }
  0xcf   :  { %v336_v42 = vand.u32 2147483647, %v333_v29 }
  0xd0   :  { %v256_v14 = vsel %vm255_vm11, %v563_v23, %v254_v10  ;;  %v400_v22 = vpop.eup %399  ;;  %v293_v32 = vadd.f32 %v291_v21, %v290_v26  ;;  %v310_v51 = vadd.f32 %v308_v44, %v307_v47 }
  0xd1   :  { %v259_v16 = vsel %vm257_vm13, %v258_v12, %v256_v14  ;;  %v324_v23 = vmul.f32 0.6931472, %v400_v22  ;;  %v402_v30 = vpop.eup %401  ;;  %v339_v50 = vmul.f32 %v371_v18, %v336_v42 }
  0xd2   :  { %v286_v20 = vsub.f32 %v259_v16, %v211_v7  ;;  %403 = vlog2.f32 %v259_v16  ;;  %v306_v38 = vmul.f32 %v259_v16, %v259_v16  ;;  %v332_v41 = vmul.f32 0.6931472, %v402_v30 }
  0xd3   :  { %v334_v34 = vsub.f32 %v324_v23, %v330_v27 }
  0xd4   :  { %v289_v25 = vmul.f32 %v286_v20, %v286_v20  ;;  %v309_v48 = vmul.f32 %v373_v28, %v306_v38  ;;  %v364_v20 = vld [vmem:[%s630_s4] sm:$0x1] }
  0xd5   :  { %v337_v39 = vand.u32 2147483647, %v334_v34 }
  0xd6   :  { %v292_v31 = vmul.f32 %v373_v28, %v289_v25  ;;  %v311_v57 = vadd.f32 %v310_v51, %v309_v48 }
  0xd7   :  { %v340_v46 = vmul.f32 %v371_v18, %v337_v39 }
  0xd8   :  { %v404_v35 = vpop.eup %403  ;;  %v294_v36 = vadd.f32 %v293_v32, %v292_v31 }
  0xd9   :  { %v326_v40 = vmul.f32 0.6931472, %v404_v35  ;;  %v342_v55 = vadd.f32 %v340_v46, %v339_v50 }
  0xda   :  { %295 = vadd.xlane.f32.xlu0 %v294_v36 }
  0xdb   :  { %v335_v45 = vsub.f32 %v326_v40, %v332_v41 }
  0xdd   :  { %v338_v49 = vand.u32 2147483647, %v335_v45 }
  0xdf   :  { %v341_v52 = vmul.f32 %v373_v28, %v338_v49 }
  0xe1   :  { %v343_v54 = vadd.f32 %v342_v55, %v341_v52 }
  0xe2   :  { %312 = vadd.xlane.f32.xlu0 %v311_v57 }
  0xe3   :  { %344 = vadd.xlane.f32.xlu1 %v343_v54 }
 0x14d   :  { %v296_v53 = vpop.xlane.xlu0 %295 }
 0x14e   :  { %v297_v58 = vrot.slane %v296_v53, 4 }
 0x150   :  { %v298_v59 = vadd.f32 %v297_v58, %v296_v53 }
 0x152   :  { %v299_v60 = vrot.slane %v298_v59, 2 }
 0x154   :  { %v300_v61 = vadd.f32 %v299_v60, %v298_v59 }
 0x155   :  { %v313_v56 = vpop.xlane.xlu0 %312 }
 0x156   :  { %v314_v62 = vrot.slane %v313_v56, 4  ;;  %v345_v63 = vpop.xlane.xlu1 %344  ;;  %v301_v43 = vrot.slane %v300_v61, 1 }
 0x157   :  { %v346_v1 = vrot.slane %v345_v63, 4 }
 0x158   :  { %v315_v2 = vadd.f32 %v314_v62, %v313_v56  ;;  %v302_v3 = vadd.f32 %v301_v43, %v300_v61 }
 0x159   :  { %v347_v4 = vadd.f32 %v346_v1, %v345_v63 }
 0x15a   :  { %v316_v5 = vrot.slane %v315_v2, 2  ;;  %374 = vpush %v302_v3 }
 0x15b   :  { %v348_v6 = vrot.slane %v347_v4, 2 }
 0x15c   :  { %v317_v7 = vadd.f32 %v316_v5, %v315_v2 }
 0x15d   :  { %v349_v9 = vadd.f32 %v348_v6, %v347_v4 }
 0x15e   :  { %v318_v10 = vrot.slane %v317_v7, 1 }
 0x15f   :  { %v350_v11 = vrot.slane %v349_v9, 1 }
 0x160   :  { %v319_v12 = vadd.f32 %v318_v10, %v317_v7 }
 0x161   :  { %v351_v13 = vadd.f32 %v350_v11, %v349_v9 }
 0x162   :  { %376 = vpush %v319_v12 }
 0x163   :  { %378 = vpush %v351_v13 }
 0x18b   :  { %s375_s11 = spop %374 }
 0x18c   :  { %v354_v14 = vstv %s375_s11 }
 0x18d   :  { %v355_v15 = vsel %vm353_vm15, %v354_v14, 0.0 }
 0x193   :  { %s377_s12 = spop %376 }
 0x194   :  { %v357_v8 = vstv %s377_s12  ;;  %s379_s13 = spop %378 }
 0x195   :  { %v358_v16 = vsel %vm356_vm0, %v357_v8, 0.0  ;;  %v361_v17 = vstv %s379_s13 }
 0x196   :  { %v359_v18 = vadd.f32 %v358_v16, %v355_v15  ;;  %v362_v19 = vsel %vm360_vm1, %v361_v17, 0.0 }
 0x198   :  { %v363_v21 = vadd.f32 %v362_v19, %v359_v18 }
 0x19a   :  { %v365_v22 = vadd.f32 %v364_v20, %v363_v21 }
 0x19c   :  { %366 = vst [vmem:[%s630_s4] sm:$0x1] %v365_v22 }

// kernel: loss_fn.3
= control target key start
LH: loop header
LB: loop body
LE: loop exit
PB: predicated region body
PF: predicated region fallthrough
CT: control target
= control target key end

     0   :  { %vm48_vm0 = vcmask 523264   ;;  %s907_s2 = inlined_call_operand.vmem [shape: f32[64,128], index: 2, kind: input, shape index: {}]   ;;  %s908_s3 = inlined_call_operand.vmem [shape: f32[64,128], index: 3, kind: input, shape index: {}]   ;;  %s909_s0 = inlined_call_operand.vmem [shape: f32[40,64], index: 0, kind: input, shape index: {}]   ;;  %s910_s1 = inlined_call_operand.vmem [shape: f32[40,64], index: 1, kind: input, shape index: {}]   ;;  %s911_s4 = inlined_call_operand.vmem [shape: f32[1,128], index: 4, kind: output, shape index: {}]  }
   0x1   :  { %v39_v0 = vld [vmem:[%s907_s2 + $0x38] sm:$0xff]  ;;  %v38_v2 = vld [vmem:[%s907_s2 + $0x30] sm:$0xff]  ;;  %v37_v4 = vld [vmem:[%s907_s2 + $0x28] sm:$0xff] }
   0x2   :  { %v47_v1 = vld [vmem:[%s908_s3 + $0x38] sm:$0xff]  ;;  %72 = vmatpush.msra.mxu0 %v39_v0  ;;  %v46_v3 = vld [vmem:[%s908_s3 + $0x30] sm:$0xff]  ;;  %151 = vmatpush.msra.mxu2 %v39_v0  ;;  %v45_v5 = vld [vmem:[%s908_s3 + $0x28] sm:$0xff] }
   0x3   :  { %104 = vmatpush.msra.mxu1 %v47_v1  ;;  %183 = vmatpush.msra.mxu3 %v47_v1  ;;  %v36_v6 = vld [vmem:[%s907_s2 + $0x20] sm:$0xff]  ;;  %v35_v8 = vld [vmem:[%s907_s2 + $0x18] sm:$0xff]  ;;  %v34_v10 = vld [vmem:[%s907_s2 + $0x10] sm:$0xff] }
   0x4   :  { %73 = vmatpush.msra.mxu0 %v38_v2  ;;  %152 = vmatpush.msra.mxu2 %v38_v2  ;;  %v44_v7 = vld [vmem:[%s908_s3 + $0x20] sm:$0xff]  ;;  %v43_v9 = vld [vmem:[%s908_s3 + $0x18] sm:$0xff]  ;;  %v42_v11 = vld [vmem:[%s908_s3 + $0x10] sm:$0xff] }
   0x5   :  { %105 = vmatpush.msra.mxu1 %v46_v3  ;;  %184 = vmatpush.msra.mxu3 %v46_v3  ;;  %v33_v12 = vld [vmem:[%s907_s2 + $0x8] sm:$0xff]  ;;  %v32_v14 = vld [vmem:[%s907_s2] sm:$0xff]  ;;  %v24_v20 = vld [vmem:[%s909_s0 + $0x10] sm:$0xff] }
   0x6   :  { %74 = vmatpush.msra.mxu0 %v37_v4  ;;  %153 = vmatpush.msra.mxu2 %v37_v4  ;;  %v41_v13 = vld [vmem:[%s908_s3 + $0x8] sm:$0xff]  ;;  %v40_v15 = vld [vmem:[%s908_s3] sm:$0xff]  ;;  %v29_v21 = vld [vmem:[%s910_s1 + $0x10] sm:$0xff] }
   0x7   :  { %106 = vmatpush.msra.mxu1 %v45_v5  ;;  %185 = vmatpush.msra.mxu3 %v45_v5  ;;  %v22_v16 = vld [vmem:[%s909_s0] sm:$0xff]  ;;  %v23_v18 = vld [vmem:[%s909_s0 + $0x8] sm:$0xff]  ;;  %v25_v22 = vld [vmem:[%s909_s0 + $0x18] sm:$0xff] }
   0x8   :  { %75 = vmatpush.msra.mxu0 %v36_v6  ;;  %154 = vmatpush.msra.mxu2 %v36_v6  ;;  %v27_v17 = vld [vmem:[%s910_s1] sm:$0xff]  ;;  %v28_v19 = vld [vmem:[%s910_s1 + $0x8] sm:$0xff]  ;;  %v30_v23 = vld [vmem:[%s910_s1 + $0x18] sm:$0xff] }
   0x9   :  { %107 = vmatpush.msra.mxu1 %v44_v7  ;;  %186 = vmatpush.msra.mxu3 %v44_v7  ;;  %v26_v24 = vld [vmem:[%s909_s0 + $0x20] sm:$0xff] }
   0xa   :  { %76 = vmatpush.msra.mxu0 %v35_v8  ;;  %155 = vmatpush.msra.mxu2 %v35_v8  ;;  %v31_v25 = vld [vmem:[%s910_s1 + $0x20] sm:$0xff] }
   0xb   :  { %108 = vmatpush.msra.mxu1 %v43_v9  ;;  %187 = vmatpush.msra.mxu3 %v43_v9 }
   0xc   :  { %77 = vmatpush.msra.mxu0 %v34_v10  ;;  %156 = vmatpush.msra.mxu2 %v34_v10 }
   0xd   :  { %109 = vmatpush.msra.mxu1 %v42_v11  ;;  %188 = vmatpush.msra.mxu3 %v42_v11 }
   0xe   :  { %78 = vmatpush.msra.mxu0 %v33_v12  ;;  %157 = vmatpush.msra.mxu2 %v33_v12 }
   0xf   :  { %110 = vmatpush.msra.mxu1 %v41_v13  ;;  %189 = vmatpush.msra.mxu3 %v41_v13 }
  0x10   :  { %79 = vmatpush.msra.mxu0 %v32_v14  ;;  %158 = vmatpush.msra.mxu2 %v32_v14 }
  0x11   :  { %111 = vmatpush.msra.mxu1 %v40_v15  ;;  %190 = vmatpush.msra.mxu3 %v40_v15 }
  0x12   :  { %520 = vmatmul.msk.f32.vlgmr.msra.gmra.mxu0 %vm48_vm0, %v22_v16  ;;  %525 = vmatmul.msk.f32.vlgmr.msra.gmra.mxu1 %vm48_vm0, %v22_v16 }
  0x13   :  { %530 = vmatmul.msk.f32.vlgmr.msra.gmra.mxu2 %vm48_vm0, %v27_v17  ;;  %535 = vmatmul.msk.f32.vlgmr.msra.gmra.mxu3 %vm48_vm0, %v27_v17 }
  0x1a   :  { %521 = vmatmul.msk.f32.gmra.mxu0 %vm48_vm0, %v23_v18  ;;  %526 = vmatmul.msk.f32.gmra.mxu1 %vm48_vm0, %v23_v18 }
  0x1b   :  { %531 = vmatmul.msk.f32.gmra.mxu2 %vm48_vm0, %v28_v19  ;;  %536 = vmatmul.msk.f32.gmra.mxu3 %vm48_vm0, %v28_v19 }
  0x22   :  { %522 = vmatmul.msk.f32.gmra.mxu0 %vm48_vm0, %v24_v20  ;;  %527 = vmatmul.msk.f32.gmra.mxu1 %vm48_vm0, %v24_v20 }
  0x23   :  { %532 = vmatmul.msk.f32.gmra.mxu2 %vm48_vm0, %v29_v21  ;;  %537 = vmatmul.msk.f32.gmra.mxu3 %vm48_vm0, %v29_v21 }
  0x2a   :  { %523 = vmatmul.msk.f32.gmra.mxu0 %vm48_vm0, %v25_v22  ;;  %528 = vmatmul.msk.f32.gmra.mxu1 %vm48_vm0, %v25_v22 }
  0x2b   :  { %533 = vmatmul.msk.f32.gmra.mxu2 %vm48_vm0, %v30_v23  ;;  %538 = vmatmul.msk.f32.gmra.mxu3 %vm48_vm0, %v30_v23 }
  0x32   :  { %524 = vmatmul.msk.f32.gmra.mxu0 %vm48_vm0, %v26_v24  ;;  %529 = vmatmul.msk.f32.gmra.mxu1 %vm48_vm0, %v26_v24 }
  0x33   :  { %534 = vmatmul.msk.f32.gmra.mxu2 %vm48_vm0, %v31_v25  ;;  %539 = vmatmul.msk.f32.gmra.mxu3 %vm48_vm0, %v31_v25  ;;  %v367_v25 = vlaneseq }
  0x8f   :  { %v81_v26 = vpop.f32.mrf.mxu0  ;;  %v113_v27 = vpop.f32.mrf.mxu1 }
  0x90   :  { %v207_v28 = vmul.f32 %v81_v26, %v81_v26  ;;  %v212_v29 = vmul.f32 %v113_v27, %v113_v27 }
  0x92   :  { %v217_v30 = vadd.f32 %v212_v29, %v207_v28 }
  0x94   :  { %v716_v31 = vmax.f32 %v217_v30, 1e-07 }
  0x96   :  { %552 = vrsqrt.f32 %v716_v31  ;;  %v160_v32 = vpop.f32.mrf.mxu2  ;;  %v192_v33 = vpop.f32.mrf.mxu3  ;;  %vm234_vm1 = vcmp.eq.f32.partialorder %v716_v31, inf  ;;  %vm236_vm2 = vcmp.eq.f32.partialorder %v716_v31, 0.0 }
  0x97   :  { %v287_v34 = vmul.f32 %v160_v32, %v160_v32  ;;  %v292_v35 = vmul.f32 %v192_v33, %v192_v33  ;;  %v84_v36 = vpop.f32.mrf.mxu0  ;;  %v116_v37 = vpop.f32.mrf.mxu1 }
  0x98   :  { %v208_v38 = vmul.f32 %v84_v36, %v84_v36  ;;  %v213_v39 = vmul.f32 %v116_v37, %v116_v37 }
  0x99   :  { %v297_v40 = vadd.f32 %v292_v35, %v287_v34 }
  0x9a   :  { %v218_v41 = vadd.f32 %v213_v39, %v208_v38  ;;  %v237_v39 = vand.u32 2147483648, %v716_v31 }
  0x9b   :  { %v719_v42 = vmax.f32 %v297_v40, 1e-07 }
  0x9c   :  { %v553_v43 = vpop.eup %552  ;;  %v721_v44 = vmax.f32 %v218_v41, 1e-07 }
  0x9d   :  { %554 = vrsqrt.f32 %v719_v42  ;;  %v228_v45 = vmul.f32 %v553_v43, %v716_v31  ;;  %vm314_vm4 = vcmp.eq.f32.partialorder %v719_v42, inf  ;;  %vm316_vm8 = vcmp.eq.f32.partialorder %v719_v42, 0.0 }
  0x9e   :  { %556 = vrsqrt.f32 %v721_v44  ;;  %v163_v46 = vpop.f32.mrf.mxu2  ;;  %v195_v47 = vpop.f32.mrf.mxu3  ;;  %vm246_vm3 = vcmp.eq.f32.partialorder %v721_v44, inf  ;;  %vm248_vm5 = vcmp.eq.f32.partialorder %v721_v44, 0.0 }
  0x9f   :  { %v288_v48 = vmul.f32 %v163_v46, %v163_v46  ;;  %v293_v49 = vmul.f32 %v195_v47, %v195_v47  ;;  %v87_v50 = vpop.f32.mrf.mxu0  ;;  %v119_v51 = vpop.f32.mrf.mxu1  ;;  %v229_v52 = vmul.f32 %v553_v43, %v228_v45 }
  0xa0   :  { %v209_v53 = vmul.f32 %v87_v50, %v87_v50  ;;  %v214_v54 = vmul.f32 %v119_v51, %v119_v51 }
  0xa1   :  { %v298_v55 = vadd.f32 %v293_v49, %v288_v48  ;;  %v230_v57 = vmul.f32 0.5, %v229_v52  ;;  %v754_v48 = vand.u32 127, %v367_v25 }
  0xa2   :  { %v219_v56 = vadd.f32 %v214_v54, %v209_v53  ;;  %v249_v54 = vand.u32 2147483648, %v721_v44 }
  0xa3   :  { %v726_v58 = vpop.eup %554  ;;  %v728_v59 = vmax.f32 %v298_v55, 1e-07  ;;  %v231_v1 = vsub.f32 1.5, %v230_v57  ;;  %vm387_vm15 = vcmp.lt.s32.totalorder %v754_v48, 33 }
  0xa4   :  { %v557_v60 = vpop.eup %556  ;;  %v730_v61 = vmax.f32 %v219_v56, 1e-07  ;;  %v308_v2 = vmul.f32 %v726_v58, %v719_v42 }
  0xa5   :  { %558 = vrsqrt.f32 %v728_v59  ;;  %v240_v62 = vmul.f32 %v557_v60, %v721_v44  ;;  %v232_v12 = vmul.f32 %v553_v43, %v231_v1  ;;  %vm326_vm6 = vcmp.eq.f32.partialorder %v728_v59, inf }
  0xa6   :  { %560 = vrsqrt.f32 %v730_v61  ;;  %v166_v63 = vpop.f32.mrf.mxu2  ;;  %v198_v0 = vpop.f32.mrf.mxu3  ;;  %v309_v13 = vmul.f32 %v726_v58, %v308_v2  ;;  %vm258_vm7 = vcmp.eq.f32.partialorder %v730_v61, inf  ;;  %vm328_vm9 = vcmp.eq.f32.partialorder %v728_v59, 0.0 }
  0xa7   :  { %v289_v3 = vmul.f32 %v166_v63, %v166_v63  ;;  %v294_v4 = vmul.f32 %v198_v0, %v198_v0  ;;  %v90_v5 = vpop.f32.mrf.mxu0  ;;  %v122_v6 = vpop.f32.mrf.mxu1  ;;  %v241_v7 = vmul.f32 %v557_v60, %v240_v62  ;;  %v233_v23 = vmul.f32 %v232_v12, %v716_v31 }
  0xa8   :  { %v210_v8 = vmul.f32 %v90_v5, %v90_v5  ;;  %v215_v9 = vmul.f32 %v122_v6, %v122_v6  ;;  %v310_v24 = vmul.f32 0.5, %v309_v13  ;;  %v317_v62 = vand.u32 2147483648, %v719_v42 }
  0xa9   :  { %v299_v10 = vadd.f32 %v294_v4, %v289_v3  ;;  %v242_v16 = vmul.f32 0.5, %v241_v7  ;;  %v235_v46 = vsel %vm234_vm1, %v716_v31, %v233_v23  ;;  %v261_v7 = vand.u32 2147483648, %v730_v61 }
  0xaa   :  { %v220_v11 = vadd.f32 %v215_v9, %v210_v8  ;;  %v311_v40 = vsub.f32 1.5, %v310_v24  ;;  %v238_v1 = vsel %vm236_vm2, %v237_v39, %v235_v46  ;;  %vm260_vm10 = vcmp.eq.f32.partialorder %v730_v61, 0.0 }
  0xab   :  { %v559_v14 = vpop.eup %558  ;;  %v738_v15 = vmax.f32 %v299_v10, 1e-07  ;;  %v243_v30 = vsub.f32 1.5, %v242_v16  ;;  %v329_v9 = vand.u32 2147483648, %v728_v59 }
  0xac   :  { %v561_v17 = vpop.eup %560  ;;  %v740_v18 = vmax.f32 %v220_v11, 1e-07  ;;  %v320_v19 = vmul.f32 %v559_v14, %v728_v59 }
  0xad   :  { %562 = vrsqrt.f32 %v738_v15  ;;  %v252_v20 = vmul.f32 %v561_v17, %v730_v61  ;;  %v244_v47 = vmul.f32 %v557_v60, %v243_v30  ;;  %v312_v60 = vmul.f32 %v726_v58, %v311_v40 }
  0xae   :  { %564 = vrsqrt.f32 %v740_v18  ;;  %v169_v21 = vpop.f32.mrf.mxu2  ;;  %v201_v22 = vpop.f32.mrf.mxu3  ;;  %v321_v35 = vmul.f32 %v559_v14, %v320_v19  ;;  %vm338_vm11 = vcmp.eq.f32.partialorder %v738_v15, inf  ;;  %vm270_vm12 = vcmp.eq.f32.partialorder %v740_v18, inf }
  0xaf   :  { %v290_v26 = vmul.f32 %v169_v21, %v169_v21  ;;  %v295_v27 = vmul.f32 %v201_v22, %v201_v22  ;;  %v93_v28 = vpop.f32.mrf.mxu0  ;;  %v125_v29 = vpop.f32.mrf.mxu1  ;;  %v253_v32 = vmul.f32 %v561_v17, %v252_v20  ;;  %v245_v3 = vmul.f32 %v244_v47, %v721_v44 }
  0xb0   :  { %v211_v33 = vmul.f32 %v93_v28, %v93_v28  ;;  %v216_v34 = vmul.f32 %v125_v29, %v125_v29  ;;  %v322_v41 = vmul.f32 0.5, %v321_v35  ;;  %v313_v31 = vmul.f32 %v312_v60, %v719_v42 }
  0xb1   :  { %v300_v36 = vadd.f32 %v295_v27, %v290_v26  ;;  %v254_v37 = vmul.f32 0.5, %v253_v32  ;;  %vm272_vm13 = vcmp.eq.f32.partialorder %v740_v18, 0.0  ;;  %v273_v24 = vand.u32 2147483648, %v740_v18 }
  0xb2   :  { %v221_v38 = vadd.f32 %v216_v34, %v211_v33  ;;  %v323_v52 = vsub.f32 1.5, %v322_v41  ;;  %v315_v26 = vsel %vm314_vm4, %v719_v42, %v313_v31  ;;  %vm340_vm14 = vcmp.eq.f32.partialorder %v738_v15, 0.0 }
  0xb3   :  { %v563_v43 = vpop.eup %562  ;;  %v750_v45 = vmax.f32 %v300_v36, 1e-07  ;;  %v255_v51 = vsub.f32 1.5, %v254_v37  ;;  %v341_v39 = vand.u32 2147483648, %v738_v15  ;;  %v368_v40 = vshrl.u32 %v367_v25, 7 }
  0xb4   :  { %v565_v49 = vpop.eup %564  ;;  %v756_v50 = vmax.f32 %v221_v38, 1e-07  ;;  %v332_v53 = vmul.f32 %v563_v43, %v738_v15  ;;  %v324_v5 = vmul.f32 %v559_v14, %v323_v52  ;;  %v812_v38 = vsel %vm316_vm8, %v317_v62, %v315_v26 }
  0xb5   :  { %566 = vrsqrt.f32 %v750_v45  ;;  %v264_v55 = vmul.f32 %v565_v49, %v740_v18  ;;  %v256_v4 = vmul.f32 %v561_v17, %v255_v51  ;;  %v247_v17 = vsel %vm246_vm3, %v721_v44, %v245_v3 }
  0xb6   :  { %568 = vrsqrt.f32 %v756_v50  ;;  %v172_v56 = vpop.f32.mrf.mxu2  ;;  %v204_v57 = vpop.f32.mrf.mxu3  ;;  %v333_v6 = vmul.f32 %v563_v43, %v332_v53  ;;  %v325_v14 = vmul.f32 %v324_v5, %v728_v59  ;;  %v250_v29 = vsel %vm248_vm5, %v249_v54, %v247_v17 }
  0xb7   :  { %v291_v63 = vmul.f32 %v172_v56, %v172_v56  ;;  %v296_v0 = vmul.f32 %v204_v57, %v204_v57  ;;  %v265_v2 = vmul.f32 %v565_v49, %v264_v55  ;;  %570 = vlog2.f32 %v238_v1 }
  0xb8   :  { %v334_v10 = vmul.f32 0.5, %v333_v6  ;;  %v257_v19 = vmul.f32 %v256_v4, %v730_v61  ;;  %v327_v32 = vsel %vm326_vm6, %v728_v59, %v325_v14  ;;  %vm282_vm0 = vcmp.eq.f32.partialorder %v756_v50, inf }
  0xb9   :  { %v301_v58 = vadd.f32 %v296_v0, %v291_v63  ;;  %v266_v8 = vmul.f32 0.5, %v265_v2  ;;  %v330_v41 = vsel %vm328_vm9, %v329_v9, %v327_v32  ;;  %vm350_vm1 = vcmp.eq.f32.partialorder %v750_v45, inf }
  0xba   :  { %v335_v20 = vsub.f32 1.5, %v334_v10  ;;  %v259_v34 = vsel %vm258_vm7, %v730_v61, %v257_v19  ;;  %vm352_vm2 = vcmp.eq.f32.partialorder %v750_v45, 0.0  ;;  %v403_v52 = vsub.f32 %v812_v38, %v238_v1 }
  0xbb   :  { %v567_v11 = vpop.eup %566  ;;  %v779_v12 = vmax.f32 %v301_v58, 1e-07  ;;  %v267_v13 = vsub.f32 1.5, %v266_v8  ;;  %v262_v42 = vsel %vm260_vm10, %v261_v7, %v259_v34  ;;  %v404_v61 = vsub.f32 %v330_v41, %v250_v29 }
  0xbc   :  { %v569_v16 = vpop.eup %568  ;;  %v344_v21 = vmul.f32 %v567_v11, %v750_v45  ;;  %v336_v27 = vmul.f32 %v563_v43, %v335_v20  ;;  %v353_v56 = vand.u32 2147483648, %v750_v45  ;;  %v372_v63 = vadd.s32 32, %v368_v40 }
  0xbd   :  { %572 = vrsqrt.f32 %v779_v12  ;;  %v268_v22 = vmul.f32 %v565_v49, %v267_v13  ;;  %v276_v23 = vmul.f32 %v569_v16, %v756_v50  ;;  %v802_v33 = vpop.eup %570  ;;  %v408_v3 = vmul.f32 %v403_v52, %v403_v52 }
  0xbe   :  { %v345_v28 = vmul.f32 %v567_v11, %v344_v21  ;;  %v337_v36 = vmul.f32 %v336_v27, %v738_v15  ;;  %574 = vlog2.f32 %v250_v29  ;;  %vm284_vm3 = vcmp.eq.f32.partialorder %v756_v50, 0.0 }
  0xbf   :  { %v277_v30 = vmul.f32 %v569_v16, %v276_v23  ;;  %v269_v35 = vmul.f32 %v268_v22, %v740_v18  ;;  %576 = vlog2.f32 %v262_v42  ;;  %v285_v7 = vand.u32 2147483648, %v756_v50 }
  0xc0   :  { %v346_v37 = vmul.f32 0.5, %v345_v28  ;;  %v339_v43 = vsel %vm338_vm11, %v738_v15, %v337_v36  ;;  %578 = vlog2.f32 %v812_v38  ;;  %vm386_vm4 = vcmp.lt.s32.totalorder %v372_v63, 34 }
  0xc1   :  { %v278_v44 = vmul.f32 0.5, %v277_v30  ;;  %v271_v25 = vsel %vm270_vm12, %v740_v18, %v269_v35  ;;  %v833_v54 = vsel %vm340_vm14, %v341_v39, %v339_v43  ;;  %580 = vlog2.f32 %v330_v41  ;;  %vm392_vm7 = vmand %vm386_vm4, %vm387_vm15 }
  0xc2   :  { %v347_v46 = vsub.f32 1.5, %v346_v37  ;;  %v274_v60 = vsel %vm272_vm13, %v273_v24, %v271_v25  ;;  %v405_v1 = vsub.f32 %v833_v54, %v262_v42  ;;  %v409_v18 = vmul.f32 %v404_v61, %v404_v61 }
  0xc3   :  { %v573_v47 = vpop.eup %572  ;;  %v279_v49 = vsub.f32 1.5, %v278_v44  ;;  %582 = vlog2.f32 %v833_v54  ;;  %vm362_vm5 = vcmp.eq.f32.partialorder %v779_v12, inf  ;;  %vm364_vm6 = vcmp.eq.f32.partialorder %v779_v12, 0.0 }
  0xc4   :  { %v348_v59 = vmul.f32 %v567_v11, %v347_v46  ;;  %v356_v51 = vmul.f32 %v573_v47, %v779_v12  ;;  %584 = vlog2.f32 %v274_v60  ;;  %v575_v58 = vpop.eup %574  ;;  %v410_v10 = vmul.f32 %v405_v1, %v405_v1 }
  0xc5   :  { %v280_v53 = vmul.f32 %v569_v16, %v279_v49  ;;  %v577_v31 = vpop.eup %576  ;;  %v432_v23 = vmul.f32 %v330_v41, %v330_v41  ;;  %v465_v26 = vmul.f32 0.6931472, %v802_v33  ;;  %v467_v27 = vmul.f32 0.6931472, %v575_v58 }
  0xc6   :  { %v349_v55 = vmul.f32 %v348_v59, %v750_v45  ;;  %v357_v57 = vmul.f32 %v573_v47, %v356_v51  ;;  %v579_v11 = vpop.eup %578  ;;  %v469_v35 = vmul.f32 0.6931472, %v577_v31  ;;  %v431_v49 = vmul.f32 %v812_v38, %v812_v38 }
  0xc7   :  { %v281_v62 = vmul.f32 %v280_v53, %v756_v50  ;;  %v581_v16 = vpop.eup %580  ;;  %v455_v21 = vmul.f32 0.6931472, %v579_v11  ;;  %v433_v25 = vmul.f32 %v833_v54, %v833_v54  ;;  %vm502_vm8 = vcmp.eq.s32.totalorder %v754_v48, 0 }
  0xc8   :  { %v351_v15 = vsel %vm350_vm1, %v750_v45, %v349_v55  ;;  %v358_v0 = vmul.f32 0.5, %v357_v57  ;;  %v592_v45 = vmov 0.0   ;;  %v457_v24 = vmul.f32 0.6931472, %v581_v16 }
  0xc9   :  { %v847_v2 = vsel %vm352_vm2, %v353_v56, %v351_v15  ;;  %v283_v4 = vsel %vm282_vm0, %v756_v50, %v281_v62  ;;  %v859_v8 = vsel %vm387_vm15, 1.0, %v592_v45  ;;  %v365_v50 = vand.u32 2147483648, %v779_v12  ;;  %v583_v22 = vpop.eup %582  ;;  %21 = vst [vmem:[%s911_s4] sm:$0x1] %v592_v45 }
  0xca   :  { %v359_v5 = vsub.f32 1.5, %v358_v0  ;;  %v406_v6 = vsub.f32 %v847_v2, %v274_v60  ;;  %586 = vlog2.f32 %v847_v2  ;;  %v286_v13 = vsel %vm284_vm3, %v285_v7, %v283_v4  ;;  %v585_v28 = vpop.eup %584 }
  0xcb   :  { %v413_v14 = vmul.f32 %v859_v8, %v408_v3  ;;  %v414_v20 = vmul.f32 %v859_v8, %v409_v18  ;;  %v415_v30 = vmul.f32 %v859_v8, %v410_v10  ;;  %588 = vlog2.f32 %v286_v13 }
  0xcc   :  { %v360_v9 = vmul.f32 %v573_v47, %v359_v5  ;;  %v411_v19 = vmul.f32 %v406_v6, %v406_v6  ;;  %v459_v32 = vmul.f32 0.6931472, %v583_v22  ;;  %v474_v36 = vsub.f32 %v455_v21, %v465_v26 }
  0xcd   :  { %v475_v37 = vsub.f32 %v457_v24, %v467_v27  ;;  %v418_v40 = vadd.f32 %v414_v20, %v413_v14  ;;  %v471_v43 = vmul.f32 0.6931472, %v585_v28  ;;  %v544_v59 = vsel %vm392_vm7, 1.0, %v592_v45 }
  0xce   :  { %v361_v17 = vmul.f32 %v360_v9, %v779_v12  ;;  %v416_v39 = vmul.f32 %v859_v8, %v411_v19  ;;  %v476_v46 = vsub.f32 %v459_v32, %v469_v35  ;;  %v479_v52 = vand.u32 2147483647, %v474_v36 }
  0xcf   :  { %v480_v47 = vand.u32 2147483647, %v475_v37  ;;  %v434_v57 = vmul.f32 %v847_v2, %v847_v2  ;;  %v437_v60 = vmul.f32 %v859_v8, %v432_v23  ;;  %v436_v54 = vmul.f32 %v859_v8, %v431_v49 }
  0xd0   :  { %v363_v29 = vsel %vm362_vm5, %v779_v12, %v361_v17  ;;  %v587_v44 = vpop.eup %586  ;;  %v419_v12 = vadd.f32 %v418_v40, %v415_v30  ;;  %v481_v53 = vand.u32 2147483647, %v476_v46  ;;  %v438_v1 = vmul.f32 %v859_v8, %v433_v25  ;;  %v513_v25 = vld [vmem:[%s911_s4] sm:$0x1] }
  0xd1   :  { %v366_v34 = vsel %vm364_vm6, %v365_v50, %v363_v29  ;;  %v461_v41 = vmul.f32 0.6931472, %v587_v44  ;;  %v589_v61 = vpop.eup %588  ;;  %v485_v63 = vmul.f32 %v859_v8, %v480_v47  ;;  %v484_v4 = vmul.f32 %v859_v8, %v479_v52 }
  0xd2   :  { %v407_v33 = vsub.f32 %v366_v34, %v286_v13  ;;  %590 = vlog2.f32 %v366_v34  ;;  %v420_v56 = vadd.f32 %v419_v12, %v416_v39  ;;  %v435_v0 = vmul.f32 %v366_v34, %v366_v34 }
  0xd3   :  { %v477_v51 = vsub.f32 %v461_v41, %v471_v43  ;;  %v473_v18 = vmul.f32 0.6931472, %v589_v61  ;;  %v486_v5 = vmul.f32 %v859_v8, %v481_v53  ;;  %v439_v2 = vmul.f32 %v859_v8, %v434_v57 }
  0xd4   :  { %v412_v42 = vmul.f32 %v407_v33, %v407_v33  ;;  %v441_v6 = vadd.f32 %v437_v60, %v436_v54  ;;  %v489_v31 = vadd.f32 %v485_v63, %v484_v4  ;;  %v440_v9 = vmul.f32 %v544_v59, %v435_v0 }
  0xd5   :  { %v482_v62 = vand.u32 2147483647, %v477_v51  ;;  %vm505_vm9 = vcmp.eq.s32.totalorder %v754_v48, 1  ;;  %vm509_vm10 = vcmp.eq.s32.totalorder %v754_v48, 2 }
  0xd6   :  { %v417_v55 = vmul.f32 %v544_v59, %v412_v42  ;;  %v442_v10 = vadd.f32 %v441_v6, %v438_v1  ;;  %v490_v13 = vadd.f32 %v489_v31, %v486_v5 }
  0xd7   :  { %v487_v7 = vmul.f32 %v859_v8, %v482_v62 }
  0xd8   :  { %v591_v38 = vpop.eup %590  ;;  %v421_v15 = vadd.f32 %v420_v56, %v417_v55  ;;  %v443_v50 = vadd.f32 %v442_v10, %v439_v2 }
  0xd9   :  { %v463_v3 = vmul.f32 0.6931472, %v591_v38  ;;  %v491_v16 = vadd.f32 %v490_v13, %v487_v7 }
  0xda   :  { %422 = vadd.xlane.f32.xlu0 %v421_v15  ;;  %v444_v17 = vadd.f32 %v443_v50, %v440_v9 }
  0xdb   :  { %v478_v58 = vsub.f32 %v463_v3, %v473_v18 }
  0xdd   :  { %v483_v11 = vand.u32 2147483647, %v478_v58 }
  0xdf   :  { %v488_v14 = vmul.f32 %v544_v59, %v483_v11 }
  0xe1   :  { %v492_v19 = vadd.f32 %v491_v16, %v488_v14 }
  0xe2   :  { %445 = vadd.xlane.f32.xlu0 %v444_v17 }
  0xe3   :  { %493 = vadd.xlane.f32.xlu1 %v492_v19 }
 0x14d   :  { %v423_v20 = vpop.xlane.xlu0 %422 }
 0x14e   :  { %v424_v21 = vrot.slane %v423_v20, 4 }
 0x150   :  { %v425_v8 = vadd.f32 %v424_v21, %v423_v20 }
 0x152   :  { %v426_v22 = vrot.slane %v425_v8, 2 }
 0x154   :  { %v427_v23 = vadd.f32 %v426_v22, %v425_v8 }
 0x155   :  { %v446_v24 = vpop.xlane.xlu0 %445 }
 0x156   :  { %v447_v26 = vrot.slane %v446_v24, 4  ;;  %v494_v27 = vpop.xlane.xlu1 %493  ;;  %v428_v28 = vrot.slane %v427_v23, 1 }
 0x157   :  { %v495_v29 = vrot.slane %v494_v27, 4 }
 0x158   :  { %v448_v30 = vadd.f32 %v447_v26, %v446_v24  ;;  %v429_v32 = vadd.f32 %v428_v28, %v427_v23 }
 0x159   :  { %v496_v34 = vadd.f32 %v495_v29, %v494_v27 }
 0x15a   :  { %v449_v35 = vrot.slane %v448_v30, 2  ;;  %545 = vpush %v429_v32 }
 0x15b   :  { %v497_v36 = vrot.slane %v496_v34, 2 }
 0x15c   :  { %v450_v37 = vadd.f32 %v449_v35, %v448_v30 }
 0x15d   :  { %v498_v44 = vadd.f32 %v497_v36, %v496_v34 }
 0x15e   :  { %v451_v33 = vrot.slane %v450_v37, 1 }
 0x15f   :  { %v499_v45 = vrot.slane %v498_v44, 1 }
 0x160   :  { %v452_v39 = vadd.f32 %v451_v33, %v450_v37 }
 0x161   :  { %v500_v40 = vadd.f32 %v499_v45, %v498_v44 }
 0x162   :  { %547 = vpush %v452_v39 }
 0x163   :  { %549 = vpush %v500_v40 }
 0x18b   :  { %s546_s13 = spop %545 }
 0x18c   :  { %v503_v41 = vstv %s546_s13 }
 0x18d   :  { %v504_v46 = vsel %vm502_vm8, %v503_v41, 0.0 }
 0x193   :  { %s548_s14 = spop %547 }
 0x194   :  { %v506_v43 = vstv %s548_s14  ;;  %s550_s15 = spop %549 }
 0x195   :  { %v507_v47 = vsel %vm505_vm9, %v506_v43, 0.0  ;;  %v510_v42 = vstv %s550_s15 }
 0x196   :  { %v508_v12 = vadd.f32 %v507_v47, %v504_v46  ;;  %v511_v49 = vsel %vm509_vm10, %v510_v42, 0.0 }
 0x198   :  { %v512_v59 = vadd.f32 %v511_v49, %v508_v12 }
 0x19a   :  { %v514_v51 = vadd.f32 %v513_v25, %v512_v59 }
 0x19c   :  { %515 = vst [vmem:[%s911_s4] sm:$0x1] %v514_v51 }

</bundles_post_ra>
